<compile_context>
chip_gen: v6e
topology: v6e:2x2x1
jax: 0.10.0
libtpu: 0.0.40
codegen_flags: <defaults>
</compile_context>

<pallas_src>
import functools

import jax
import jax.numpy as jnp
from jax.experimental import pallas as pl
from jax.experimental.pallas import tpu as pltpu


def _round_up(x, m):
    return ((x + m - 1) // m) * m


def _sublane_multiple(dtype):
    """Minimum second-to-last-dim tile multiple for a dtype on TPU."""
    size = jnp.dtype(dtype).itemsize
    if size >= 4:
        return 8
    if size == 2:
        return 16
    return 32


def _lane_fold(x):
    """(r, w) -> (r, 128) sum over 128-lane groups; w must be 128 * 2**a.

    Pure VPU adds on static, 128-aligned lane slices (no cross-lane XLU work).
    """
    w = x.shape[1]
    while w > 128:
        half = w // 2
        x = x[:, :half] + x[:, half:]
        w = half
    return x


def _loss_sums_kernel(p_ref, t_ref, inter_ref, psum_ref, tsum_ref, bce_ref,
                      *, cps, m_total, sub_tn, binary_targets):
    s = pl.program_id(0)       # v7x megacore split of the reduction range
    j = pl.program_id(2)       # chunk within the split (reduction axis, last)

    @pl.when(j == 0)
    def _():
        inter_ref[...] = jnp.zeros_like(inter_ref)
        psum_ref[...] = jnp.zeros_like(psum_ref)
        tsum_ref[...] = jnp.zeros_like(tsum_ref)
        bce_ref[...] = jnp.zeros_like(bce_ref)

    r_blk, tn = p_ref.shape
    n_sub = tn // sub_tn
    col0 = (s * cps + j) * tn          # global column offset of this chunk
    rem = m_total - col0               # valid columns left (<= 0 => overflow chunk)

    def accumulate(p, t):
        # p, t: f32 (r_blk, sub_tn), already masked when needed.
        inter_ref[...] += _lane_fold(p * t)
        psum_ref[...] += _lane_fold(p)
        tsum_ref[...] += _lane_fold(t)
        if binary_targets:
            # One log + one select; exact for t in {0,1} (masked cols give q=1 -> 0).
            q = jnp.where(t != 0.0, p, 1.0 - p)
            bce = -jnp.maximum(jnp.log(q), -100.0)
        else:
            # General BCE (handles soft targets); torch clamps log terms at -100.
            log_p = jnp.maximum(jnp.log(p), -100.0)
            log_1mp = jnp.maximum(jnp.log(1.0 - p), -100.0)
            bce = -(t * log_p + (1.0 - t) * log_1mp)
        bce_ref[...] += _lane_fold(bce)

    # ---- fast path: every column of this chunk is valid (no mask work) -----
    @pl.when(rem >= tn)
    def _():
        for k in range(n_sub):
            off = k * sub_tn
            p = p_ref[:, off:off + sub_tn].astype(jnp.float32)
            t = t_ref[:, off:off + sub_tn].astype(jnp.float32)
            accumulate(p, t)

    # ---- tail path: the single partial chunk per split ---------------------
    @pl.when((rem > 0) & (rem < tn))
    def _():
        lane = jax.lax.broadcasted_iota(jnp.int32, (r_blk, sub_tn), 1)
        for k in range(n_sub):
            off = k * sub_tn

            @pl.when(rem > off)        # skip fully-invalid sub-chunks
            def _(off=off):
                valid = lane < (rem - off)
                p = jnp.where(valid,
                              p_ref[:, off:off + sub_tn].astype(jnp.float32), 0.0)
                t = jnp.where(valid,
                              t_ref[:, off:off + sub_tn].astype(jnp.float32), 0.0)
                accumulate(p, t)
    # Overflow chunk (rem <= 0; only when n_col is odd and the range is split
    # across cores): nothing to do — its DMA is clamped onto a valid block.


def bce_dice_loss(inputs, targets, smooth=1.0, *,
                  tn_target=131072, step_bytes=12 * 1024 * 1024,
                  assume_binary_targets=None):
    """Sum over classes of [dice loss + mean BCE] for NCDHW probability maps.

    inputs : [B,C,D,H,W] probabilities in (0,1); f32 or bf16 are streamed in
             their native dtype and cast to f32 per tile inside the kernel.
    targets: [B,C,D,H,W] masks; f32 / bf16 / int8 / bool.  Integer/bool
             targets use the exact single-log BCE (valid BCE targets that are
             integers are necessarily {0,1}); floating targets use the general
             two-log formula so soft labels remain correct.
    """
    B, C, D, H, W = inputs.shape
    R = B * C                       # one row per (batch, class)
    M = D * H * W                   # elements per row

    # Native-dtype streaming: only normalize dtypes the kernel can't take.
    if inputs.dtype.name not in ("float32", "bfloat16"):
        inputs = inputs.astype(jnp.float32)
    if targets.dtype.name == "bool":
        targets = targets.astype(jnp.int8)
    elif targets.dtype.name not in ("float32", "bfloat16", "int8", "int32"):
        targets = targets.astype(jnp.float32)

    if assume_binary_targets is None:
        assume_binary_targets = bool(jnp.issubdtype(targets.dtype, jnp.integer))

    # Contiguous, zero-copy flatten (no transpose, no pad).
    p = inputs.reshape(R, M)
    t = targets.reshape(R, M)

    # ---- row block: respect packed-dtype sublane tiles ---------------------
    sub_req = max(_sublane_multiple(p.dtype), _sublane_multiple(t.dtype))
    if sub_req > 8 and R < sub_req:
        # Rare: fewer rows than the packed dtype's sublane tile -> upcast so
        # the full-dim row block is legal (costs one extra HBM pass).
        p = p.astype(jnp.float32)
        t = t.astype(jnp.float32)
        sub_req = 8
    if R <= 64 and (sub_req == 8 or R % sub_req == 0):
        r_blk, nrb = R, 1            # block dim == full array dim is always legal
    else:
        r_blk = max(sub_req, min(32, (R // sub_req) * sub_req))
        nrb = pl.cdiv(R, r_blk)      # garbage rows of a partial last block are
                                     # sliced off in the epilogue

    # ---- lane tile: biggest 128 * 2**a within the per-step byte budget -----
    # step_bytes ~ per-grid-step HBM traffic (p + t).  Raise to 16-24 MiB on
    # v7x/v6e for even lower per-step overhead (budgeted vmem_limit below).
    bytes_per_col = r_blk * (p.dtype.itemsize + t.dtype.itemsize)
    budget_tn = max(128, (step_bytes // bytes_per_col) // 128 * 128)
    limit = max(128, min(tn_target, budget_tn))
    m_cap = _round_up(M, 128)
    tn = 128
    while tn * 2 <= limit and tn < m_cap:
        tn *= 2
    sub_tn = min(tn, 4096)           # bounds in-kernel temporaries

    n_col = pl.cdiv(M, tn)
    n_split = 2 if n_col >= 2 else 1          # v7x: one half per TensorCore
    cps = pl.cdiv(n_col, n_split)

    def in_map(s, i, j):
        # Overflow chunks of the last split are clamped onto a valid block and
        # fully skipped inside the kernel (rem <= 0).
        return (i, jnp.minimum(s * cps + j, n_col - 1))

    out_shape = jax.ShapeDtypeStruct((n_split * nrb, r_blk, 128), jnp.float32)
    out_spec = pl.BlockSpec((None, r_blk, 128), lambda s, i, j: (s * nrb + i, 0, 0))

    # Explicit VMEM budget: double-buffered inputs + bounded temporaries.
    vmem_need = 2 * r_blk * tn * (p.dtype.itemsize + t.dtype.itemsize)
    vmem_need += 8 * r_blk * sub_tn * 4
    vmem_need += 8 * 4 * r_blk * 128 * 4
    vmem_limit = int(min(max(vmem_need * 3 // 2 + (2 << 20), 16 << 20), 48 << 20))

    kernel = functools.partial(
        _loss_sums_kernel, cps=cps, m_total=M, sub_tn=sub_tn,
        binary_targets=assume_binary_targets)

    inter_s, psum_s, tsum_s, bce_s = pl.pallas_call(
        kernel,
        out_shape=(out_shape, out_shape, out_shape, out_shape),
        grid_spec=pltpu.PrefetchScalarGridSpec(
            num_scalar_prefetch=0,
            grid=(n_split, nrb, cps),
            in_specs=[
                pl.BlockSpec((r_blk, tn), in_map),
                pl.BlockSpec((r_blk, tn), in_map),
            ],
            out_specs=[out_spec, out_spec, out_spec, out_spec],
        ),
        compiler_params=pltpu.CompilerParams(
            dimension_semantics=("parallel", "parallel", "arbitrary"),
            vmem_limit_bytes=vmem_limit),
    )(p, t)

    def per_class(acc):  # (n_split*nrb, r_blk, 128) -> (C,)
        acc = acc.reshape(n_split, nrb, r_blk, 128).sum(axis=(0, 3))   # (nrb, r_blk)
        acc = acc.reshape(nrb * r_blk)[:R]                             # real rows only
        return acc.reshape(B, C).sum(axis=0)                           # (C,)

    inter_c = per_class(inter_s)
    psum_c = per_class(psum_s)
    tsum_c = per_class(tsum_s)
    bsum_c = per_class(bce_s)

    dice_per_class = 1.0 - (2.0 * inter_c + smooth) / (psum_c + tsum_c + smooth)
    bce_per_class = bsum_c / (B * M)     # reduction='mean' over B*D*H*W per class
    return jnp.sum(dice_per_class + bce_per_class)


def _reference(inputs, targets, smooth=1.0):
    """Pure-JAX reference mirroring the PyTorch module."""
    inputs = inputs.astype(jnp.float32)
    targets = targets.astype(jnp.float32)
    total = 0.0
    for c in range(inputs.shape[1]):
        p = inputs[:, c].reshape(-1)
        t = targets[:, c].reshape(-1)
        inter = jnp.sum(p * t)
        dice = 1.0 - (2.0 * inter + smooth) / (jnp.sum(p) + jnp.sum(t) + smooth)
        log_p = jnp.maximum(jnp.log(p), -100.0)
        log_1mp = jnp.maximum(jnp.log(1.0 - p), -100.0)
        bce = jnp.mean(-(t * log_p + (1.0 - t) * log_1mp))
        total = total + dice + bce
    return total


if __name__ == "__main__":
    root = jax.random.PRNGKey(0)

    # (shape, pred_dtype, tgt_dtype, tn_target)
    cases = [
        ((2, 6, 4, 8, 8),    jnp.float32,  jnp.float32, 131072),  # module default n_classes=6
        ((2, 16, 4, 8, 12),  jnp.bfloat16, jnp.int8,    131072),  # native packed dtypes, masked tail
        ((4, 20, 6, 10, 17), jnp.bfloat16, jnp.int8,    256),     # R>64 row blocks, multi-chunk + split
        ((2, 5, 5, 7, 19),   jnp.float32,  jnp.float32, 256),     # odd chunk count -> skipped overflow chunk
    ]
    for idx, (shape, pdt, tdt, tnt) in enumerate(cases):
        k1, k2 = jax.random.split(jax.random.fold_in(root, idx))
        # predictions must be probabilities in (0, 1); targets are binary masks
        preds = jax.nn.sigmoid(jax.random.normal(k1, shape, jnp.float32)).astype(pdt)
        tgts = (jax.random.uniform(k2, shape) > 0.5).astype(tdt)

        out = jax.block_until_ready(bce_dice_loss(preds, tgts, tn_target=tnt))
        ref = _reference(preds, tgts)
        assert jnp.allclose(out, ref, rtol=1e-4, atol=1e-4), (shape, out, ref)

    print("KERNEL_OK")
</pallas_src>

<mosaic_0001>
module attributes {stable_mosaic.version = 11 : i64} {
  func.func @_loss_sums_kernel(%arg0: i32, %arg1: i32, %arg2: i32, %arg3: memref<12x256xf32, #tpu.memory_space<vmem>>, %arg4: memref<12x256xf32, #tpu.memory_space<vmem>>, %arg5: memref<1x12x128xf32, #tpu.memory_space<vmem>>, %arg6: memref<1x12x128xf32, #tpu.memory_space<vmem>>, %arg7: memref<1x12x128xf32, #tpu.memory_space<vmem>>, %arg8: memref<1x12x128xf32, #tpu.memory_space<vmem>>) attributes {dimension_semantics = [#tpu.dimension_semantics<parallel>, #tpu.dimension_semantics<parallel>, #tpu.dimension_semantics<arbitrary>], iteration_bounds = array<i64: 1, 1, 1>, scalar_prefetch = 0 : i64, scratch_operands = 0 : i64, tpu.core_type = #tpu.core_type<tc>, window_params = [{transform_indices = @transform_0, window_bounds = array<i64: 12, 256>}, {transform_indices = @transform_1, window_bounds = array<i64: 12, 256>}, {transform_indices = @transform_2, window_bounds = array<i64: 1, 12, 128>}, {transform_indices = @transform_3, window_bounds = array<i64: 1, 12, 128>}, {transform_indices = @transform_4, window_bounds = array<i64: 1, 12, 128>}, {transform_indices = @transform_5, window_bounds = array<i64: 1, 12, 128>}]} {
    %c0_i32 = arith.constant 0 : i32
    %0 = arith.cmpi eq, %arg2, %c0_i32 : i32
    %1 = arith.extui %0 : i1 to i32
    %c0_i32_0 = arith.constant 0 : i32
    %2 = arith.cmpi ne, %1, %c0_i32_0 : i32
    scf.if %2 {
      %cst = arith.constant 0.000000e+00 : f32
      %15 = vector.broadcast %cst : f32 to vector<12x128xf32>
      %c0 = arith.constant 0 : index
      %c0_7 = arith.constant 0 : index
      %c0_8 = arith.constant 0 : index
      %16 = vector.load %arg5[%c0, %c0_7, %c0_8] : memref<1x12x128xf32, #tpu.memory_space<vmem>>, vector<1x12x128xf32>
      %17 = vector.shape_cast %16 : vector<1x12x128xf32> to vector<12x128xf32>
      %18 = vector.shape_cast %15 : vector<12x128xf32> to vector<1x12x128xf32>
      tpu.vector_store %arg5[%c0, %c0_7, %c0_8], %18 {strides = array<i32>} : memref<1x12x128xf32, #tpu.memory_space<vmem>>, vector<1x12x128xf32>,
      %cst_9 = arith.constant 0.000000e+00 : f32
      %19 = vector.broadcast %cst_9 : f32 to vector<12x128xf32>
      %c0_10 = arith.constant 0 : index
      %c0_11 = arith.constant 0 : index
      %c0_12 = arith.constant 0 : index
      %20 = vector.load %arg6[%c0_10, %c0_11, %c0_12] : memref<1x12x128xf32, #tpu.memory_space<vmem>>, vector<1x12x128xf32>
      %21 = vector.shape_cast %20 : vector<1x12x128xf32> to vector<12x128xf32>
      %22 = vector.shape_cast %19 : vector<12x128xf32> to vector<1x12x128xf32>
      tpu.vector_store %arg6[%c0_10, %c0_11, %c0_12], %22 {strides = array<i32>} : memref<1x12x128xf32, #tpu.memory_space<vmem>>, vector<1x12x128xf32>,
      %cst_13 = arith.constant 0.000000e+00 : f32
      %23 = vector.broadcast %cst_13 : f32 to vector<12x128xf32>
      %c0_14 = arith.constant 0 : index
      %c0_15 = arith.constant 0 : index
      %c0_16 = arith.constant 0 : index
      %24 = vector.load %arg7[%c0_14, %c0_15, %c0_16] : memref<1x12x128xf32, #tpu.memory_space<vmem>>, vector<1x12x128xf32>
      %25 = vector.shape_cast %24 : vector<1x12x128xf32> to vector<12x128xf32>
      %26 = vector.shape_cast %23 : vector<12x128xf32> to vector<1x12x128xf32>
      tpu.vector_store %arg7[%c0_14, %c0_15, %c0_16], %26 {strides = array<i32>} : memref<1x12x128xf32, #tpu.memory_space<vmem>>, vector<1x12x128xf32>,
      %cst_17 = arith.constant 0.000000e+00 : f32
      %27 = vector.broadcast %cst_17 : f32 to vector<12x128xf32>
      %c0_18 = arith.constant 0 : index
      %c0_19 = arith.constant 0 : index
      %c0_20 = arith.constant 0 : index
      %28 = vector.load %arg8[%c0_18, %c0_19, %c0_20] : memref<1x12x128xf32, #tpu.memory_space<vmem>>, vector<1x12x128xf32>
      %29 = vector.shape_cast %28 : vector<1x12x128xf32> to vector<12x128xf32>
      %30 = vector.shape_cast %27 : vector<12x128xf32> to vector<1x12x128xf32>
      tpu.vector_store %arg8[%c0_18, %c0_19, %c0_20], %30 {strides = array<i32>} : memref<1x12x128xf32, #tpu.memory_space<vmem>>, vector<1x12x128xf32>,
    } else {
    }
    %c1_i32 = arith.constant 1 : i32
    %3 = arith.muli %arg0, %c1_i32 : i32
    %4 = arith.addi %3, %arg2 : i32
    %c256_i32 = arith.constant 256 : i32
    %5 = arith.muli %4, %c256_i32 : i32
    %c256_i32_1 = arith.constant 256 : i32
    %6 = arith.subi %c256_i32_1, %5 : i32
    %c256_i32_2 = arith.constant 256 : i32
    %7 = arith.cmpi sge, %6, %c256_i32_2 : i32
    %8 = arith.extui %7 : i1 to i32
    %c0_i32_3 = arith.constant 0 : i32
    %9 = arith.cmpi ne, %8, %c0_i32_3 : i32
    scf.if %9 {
      %c0 = arith.constant 0 : index
      %c0_7 = arith.constant 0 : index
      %15 = vector.load %arg3[%c0, %c0_7] : memref<12x256xf32, #tpu.memory_space<vmem>>, vector<12x256xf32>
      %c0_8 = arith.constant 0 : index
      %c0_9 = arith.constant 0 : index
      %16 = vector.load %arg4[%c0_8, %c0_9] : memref<12x256xf32, #tpu.memory_space<vmem>>, vector<12x256xf32>
      %c0_10 = arith.constant 0 : index
      %c0_11 = arith.constant 0 : index
      %c0_12 = arith.constant 0 : index
      %17 = vector.load %arg5[%c0_10, %c0_11, %c0_12] : memref<1x12x128xf32, #tpu.memory_space<vmem>>, vector<1x12x128xf32>
      %18 = vector.shape_cast %17 : vector<1x12x128xf32> to vector<12x128xf32>
      %19 = arith.mulf %15, %16 : vector<12x256xf32>
      %20 = vector.extract_strided_slice %19 {offsets = [0, 0], sizes = [12, 128], strides = [1, 1]} : vector<12x256xf32> to vector<12x128xf32>
      %21 = vector.extract_strided_slice %19 {offsets = [0, 128], sizes = [12, 128], strides = [1, 1]} : vector<12x256xf32> to vector<12x128xf32>
      %22 = arith.addf %20, %21 : vector<12x128xf32>
      %23 = arith.addf %18, %22 : vector<12x128xf32>
      %c0_13 = arith.constant 0 : index
      %c0_14 = arith.constant 0 : index
      %c0_15 = arith.constant 0 : index
      %24 = vector.load %arg5[%c0_13, %c0_14, %c0_15] : memref<1x12x128xf32, #tpu.memory_space<vmem>>, vector<1x12x128xf32>
      %25 = vector.shape_cast %24 : vector<1x12x128xf32> to vector<12x128xf32>
      %26 = vector.shape_cast %23 : vector<12x128xf32> to vector<1x12x128xf32>
      tpu.vector_store %arg5[%c0_13, %c0_14, %c0_15], %26 {strides = array<i32>} : memref<1x12x128xf32, #tpu.memory_space<vmem>>, vector<1x12x128xf32>,
      %c0_16 = arith.constant 0 : index
      %c0_17 = arith.constant 0 : index
      %c0_18 = arith.constant 0 : index
      %27 = vector.load %arg6[%c0_16, %c0_17, %c0_18] : memref<1x12x128xf32, #tpu.memory_space<vmem>>, vector<1x12x128xf32>
      %28 = vector.shape_cast %27 : vector<1x12x128xf32> to vector<12x128xf32>
      %29 = vector.extract_strided_slice %15 {offsets = [0, 0], sizes = [12, 128], strides = [1, 1]} : vector<12x256xf32> to vector<12x128xf32>
      %30 = vector.extract_strided_slice %15 {offsets = [0, 128], sizes = [12, 128], strides = [1, 1]} : vector<12x256xf32> to vector<12x128xf32>
      %31 = arith.addf %29, %30 : vector<12x128xf32>
      %32 = arith.addf %28, %31 : vector<12x128xf32>
      %c0_19 = arith.constant 0 : index
      %c0_20 = arith.constant 0 : index
      %c0_21 = arith.constant 0 : index
      %33 = vector.load %arg6[%c0_19, %c0_20, %c0_21] : memref<1x12x128xf32, #tpu.memory_space<vmem>>, vector<1x12x128xf32>
      %34 = vector.shape_cast %33 : vector<1x12x128xf32> to vector<12x128xf32>
      %35 = vector.shape_cast %32 : vector<12x128xf32> to vector<1x12x128xf32>
      tpu.vector_store %arg6[%c0_19, %c0_20, %c0_21], %35 {strides = array<i32>} : memref<1x12x128xf32, #tpu.memory_space<vmem>>, vector<1x12x128xf32>,
      %c0_22 = arith.constant 0 : index
      %c0_23 = arith.constant 0 : index
      %c0_24 = arith.constant 0 : index
      %36 = vector.load %arg7[%c0_22, %c0_23, %c0_24] : memref<1x12x128xf32, #tpu.memory_space<vmem>>, vector<1x12x128xf32>
      %37 = vector.shape_cast %36 : vector<1x12x128xf32> to vector<12x128xf32>
      %38 = vector.extract_strided_slice %16 {offsets = [0, 0], sizes = [12, 128], strides = [1, 1]} : vector<12x256xf32> to vector<12x128xf32>
      %39 = vector.extract_strided_slice %16 {offsets = [0, 128], sizes = [12, 128], strides = [1, 1]} : vector<12x256xf32> to vector<12x128xf32>
      %40 = arith.addf %38, %39 : vector<12x128xf32>
      %41 = arith.addf %37, %40 : vector<12x128xf32>
      %c0_25 = arith.constant 0 : index
      %c0_26 = arith.constant 0 : index
      %c0_27 = arith.constant 0 : index
      %42 = vector.load %arg7[%c0_25, %c0_26, %c0_27] : memref<1x12x128xf32, #tpu.memory_space<vmem>>, vector<1x12x128xf32>
      %43 = vector.shape_cast %42 : vector<1x12x128xf32> to vector<12x128xf32>
      %44 = vector.shape_cast %41 : vector<12x128xf32> to vector<1x12x128xf32>
      tpu.vector_store %arg7[%c0_25, %c0_26, %c0_27], %44 {strides = array<i32>} : memref<1x12x128xf32, #tpu.memory_space<vmem>>, vector<1x12x128xf32>,
      %45 = math.log %15 : vector<12x256xf32>
      %cst = arith.constant -1.000000e+02 : f32
      %46 = vector.broadcast %cst : f32 to vector<12x256xf32>
      %47 = arith.maximumf %45, %46 : vector<12x256xf32>
      %cst_28 = arith.constant 1.000000e+00 : f32
      %48 = vector.broadcast %cst_28 : f32 to vector<12x256xf32>
      %49 = arith.subf %48, %15 : vector<12x256xf32>
      %50 = math.log %49 : vector<12x256xf32>
      %cst_29 = arith.constant -1.000000e+02 : f32
      %51 = vector.broadcast %cst_29 : f32 to vector<12x256xf32>
      %52 = arith.maximumf %50, %51 : vector<12x256xf32>
      %53 = arith.mulf %16, %47 : vector<12x256xf32>
      %cst_30 = arith.constant 1.000000e+00 : f32
      %54 = vector.broadcast %cst_30 : f32 to vector<12x256xf32>
      %55 = arith.subf %54, %16 : vector<12x256xf32>
      %56 = arith.mulf %55, %52 : vector<12x256xf32>
      %57 = arith.addf %53, %56 : vector<12x256xf32>
      %cst_31 = arith.constant 0.000000e+00 : f32
      %58 = vector.broadcast %cst_31 : f32 to vector<12x256xf32>
      %59 = arith.subf %58, %57 : vector<12x256xf32>
      %c0_32 = arith.constant 0 : index
      %c0_33 = arith.constant 0 : index
      %c0_34 = arith.constant 0 : index
      %60 = vector.load %arg8[%c0_32, %c0_33, %c0_34] : memref<1x12x128xf32, #tpu.memory_space<vmem>>, vector<1x12x128xf32>
      %61 = vector.shape_cast %60 : vector<1x12x128xf32> to vector<12x128xf32>
      %62 = vector.extract_strided_slice %59 {offsets = [0, 0], sizes = [12, 128], strides = [1, 1]} : vector<12x256xf32> to vector<12x128xf32>
      %63 = vector.extract_strided_slice %59 {offsets = [0, 128], sizes = [12, 128], strides = [1, 1]} : vector<12x256xf32> to vector<12x128xf32>
      %64 = arith.addf %62, %63 : vector<12x128xf32>
      %65 = arith.addf %61, %64 : vector<12x128xf32>
      %c0_35 = arith.constant 0 : index
      %c0_36 = arith.constant 0 : index
      %c0_37 = arith.constant 0 : index
      %66 = vector.load %arg8[%c0_35, %c0_36, %c0_37] : memref<1x12x128xf32, #tpu.memory_space<vmem>>, vector<1x12x128xf32>
      %67 = vector.shape_cast %66 : vector<1x12x128xf32> to vector<12x128xf32>
      %68 = vector.shape_cast %65 : vector<12x128xf32> to vector<1x12x128xf32>
      tpu.vector_store %arg8[%c0_35, %c0_36, %c0_37], %68 {strides = array<i32>} : memref<1x12x128xf32, #tpu.memory_space<vmem>>, vector<1x12x128xf32>,
    } else {
    }
    %c0_i32_4 = arith.constant 0 : i32
    %10 = arith.cmpi sgt, %6, %c0_i32_4 : i32
    %c256_i32_5 = arith.constant 256 : i32
    %11 = arith.cmpi slt, %6, %c256_i32_5 : i32
    %12 = arith.andi %10, %11 : i1
    %13 = arith.extui %12 : i1 to i32
    %c0_i32_6 = arith.constant 0 : i32
    %14 = arith.cmpi ne, %13, %c0_i32_6 : i32
    scf.if %14 {
      %15 = tpu.iota {dimensions = array<i32: 1>} : vector<12x256xi32>
      %c0_i32_7 = arith.constant 0 : i32
      %16 = arith.cmpi sgt, %6, %c0_i32_7 : i32
      %17 = arith.extui %16 : i1 to i32
      %c0_i32_8 = arith.constant 0 : i32
      %18 = arith.cmpi ne, %17, %c0_i32_8 : i32
      scf.if %18 {
        %c0_i32_9 = arith.constant 0 : i32
        %19 = arith.subi %6, %c0_i32_9 : i32
        %20 = vector.broadcast %19 : i32 to vector<12x256xi32>
        %21 = arith.cmpi slt, %15, %20 : vector<12x256xi32>
        %c0 = arith.constant 0 : index
        %c0_10 = arith.constant 0 : index
        %22 = vector.load %arg3[%c0, %c0_10] : memref<12x256xf32, #tpu.memory_space<vmem>>, vector<12x256xf32>
        %cst = arith.constant 0.000000e+00 : f32
        %23 = vector.broadcast %cst : f32 to vector<12x256xf32>
        %24 = arith.select %21, %22, %23 : vector<12x256xi1>, vector<12x256xf32>
        %c0_11 = arith.constant 0 : index
        %c0_12 = arith.constant 0 : index
        %25 = vector.load %arg4[%c0_11, %c0_12] : memref<12x256xf32, #tpu.memory_space<vmem>>, vector<12x256xf32>
        %cst_13 = arith.constant 0.000000e+00 : f32
        %26 = vector.broadcast %cst_13 : f32 to vector<12x256xf32>
        %27 = arith.select %21, %25, %26 : vector<12x256xi1>, vector<12x256xf32>
        %c0_14 = arith.constant 0 : index
        %c0_15 = arith.constant 0 : index
        %c0_16 = arith.constant 0 : index
        %28 = vector.load %arg5[%c0_14, %c0_15, %c0_16] : memref<1x12x128xf32, #tpu.memory_space<vmem>>, vector<1x12x128xf32>
        %29 = vector.shape_cast %28 : vector<1x12x128xf32> to vector<12x128xf32>
        %30 = arith.mulf %24, %27 : vector<12x256xf32>
        %31 = vector.extract_strided_slice %30 {offsets = [0, 0], sizes = [12, 128], strides = [1, 1]} : vector<12x256xf32> to vector<12x128xf32>
        %32 = vector.extract_strided_slice %30 {offsets = [0, 128], sizes = [12, 128], strides = [1, 1]} : vector<12x256xf32> to vector<12x128xf32>
        %33 = arith.addf %31, %32 : vector<12x128xf32>
        %34 = arith.addf %29, %33 : vector<12x128xf32>
        %c0_17 = arith.constant 0 : index
        %c0_18 = arith.constant 0 : index
        %c0_19 = arith.constant 0 : index
        %35 = vector.load %arg5[%c0_17, %c0_18, %c0_19] : memref<1x12x128xf32, #tpu.memory_space<vmem>>, vector<1x12x128xf32>
        %36 = vector.shape_cast %35 : vector<1x12x128xf32> to vector<12x128xf32>
        %37 = vector.shape_cast %34 : vector<12x128xf32> to vector<1x12x128xf32>
        tpu.vector_store %arg5[%c0_17, %c0_18, %c0_19], %37 {strides = array<i32>} : memref<1x12x128xf32, #tpu.memory_space<vmem>>, vector<1x12x128xf32>,
        %c0_20 = arith.constant 0 : index
        %c0_21 = arith.constant 0 : index
        %c0_22 = arith.constant 0 : index
        %38 = vector.load %arg6[%c0_20, %c0_21, %c0_22] : memref<1x12x128xf32, #tpu.memory_space<vmem>>, vector<1x12x128xf32>
        %39 = vector.shape_cast %38 : vector<1x12x128xf32> to vector<12x128xf32>
        %40 = vector.extract_strided_slice %24 {offsets = [0, 0], sizes = [12, 128], strides = [1, 1]} : vector<12x256xf32> to vector<12x128xf32>
        %41 = vector.extract_strided_slice %24 {offsets = [0, 128], sizes = [12, 128], strides = [1, 1]} : vector<12x256xf32> to vector<12x128xf32>
        %42 = arith.addf %40, %41 : vector<12x128xf32>
        %43 = arith.addf %39, %42 : vector<12x128xf32>
        %c0_23 = arith.constant 0 : index
        %c0_24 = arith.constant 0 : index
        %c0_25 = arith.constant 0 : index
        %44 = vector.load %arg6[%c0_23, %c0_24, %c0_25] : memref<1x12x128xf32, #tpu.memory_space<vmem>>, vector<1x12x128xf32>
        %45 = vector.shape_cast %44 : vector<1x12x128xf32> to vector<12x128xf32>
        %46 = vector.shape_cast %43 : vector<12x128xf32> to vector<1x12x128xf32>
        tpu.vector_store %arg6[%c0_23, %c0_24, %c0_25], %46 {strides = array<i32>} : memref<1x12x128xf32, #tpu.memory_space<vmem>>, vector<1x12x128xf32>,
        %c0_26 = arith.constant 0 : index
        %c0_27 = arith.constant 0 : index
        %c0_28 = arith.constant 0 : index
        %47 = vector.load %arg7[%c0_26, %c0_27, %c0_28] : memref<1x12x128xf32, #tpu.memory_space<vmem>>, vector<1x12x128xf32>
        %48 = vector.shape_cast %47 : vector<1x12x128xf32> to vector<12x128xf32>
        %49 = vector.extract_strided_slice %27 {offsets = [0, 0], sizes = [12, 128], strides = [1, 1]} : vector<12x256xf32> to vector<12x128xf32>
        %50 = vector.extract_strided_slice %27 {offsets = [0, 128], sizes = [12, 128], strides = [1, 1]} : vector<12x256xf32> to vector<12x128xf32>
        %51 = arith.addf %49, %50 : vector<12x128xf32>
        %52 = arith.addf %48, %51 : vector<12x128xf32>
        %c0_29 = arith.constant 0 : index
        %c0_30 = arith.constant 0 : index
        %c0_31 = arith.constant 0 : index
        %53 = vector.load %arg7[%c0_29, %c0_30, %c0_31] : memref<1x12x128xf32, #tpu.memory_space<vmem>>, vector<1x12x128xf32>
        %54 = vector.shape_cast %53 : vector<1x12x128xf32> to vector<12x128xf32>
        %55 = vector.shape_cast %52 : vector<12x128xf32> to vector<1x12x128xf32>
        tpu.vector_store %arg7[%c0_29, %c0_30, %c0_31], %55 {strides = array<i32>} : memref<1x12x128xf32, #tpu.memory_space<vmem>>, vector<1x12x128xf32>,
        %56 = math.log %24 : vector<12x256xf32>
        %cst_32 = arith.constant -1.000000e+02 : f32
        %57 = vector.broadcast %cst_32 : f32 to vector<12x256xf32>
        %58 = arith.maximumf %56, %57 : vector<12x256xf32>
        %cst_33 = arith.constant 1.000000e+00 : f32
        %59 = vector.broadcast %cst_33 : f32 to vector<12x256xf32>
        %60 = arith.subf %59, %24 : vector<12x256xf32>
        %61 = math.log %60 : vector<12x256xf32>
        %cst_34 = arith.constant -1.000000e+02 : f32
        %62 = vector.broadcast %cst_34 : f32 to vector<12x256xf32>
        %63 = arith.maximumf %61, %62 : vector<12x256xf32>
        %64 = arith.mulf %27, %58 : vector<12x256xf32>
        %cst_35 = arith.constant 1.000000e+00 : f32
        %65 = vector.broadcast %cst_35 : f32 to vector<12x256xf32>
        %66 = arith.subf %65, %27 : vector<12x256xf32>
        %67 = arith.mulf %66, %63 : vector<12x256xf32>
        %68 = arith.addf %64, %67 : vector<12x256xf32>
        %cst_36 = arith.constant 0.000000e+00 : f32
        %69 = vector.broadcast %cst_36 : f32 to vector<12x256xf32>
        %70 = arith.subf %69, %68 : vector<12x256xf32>
        %c0_37 = arith.constant 0 : index
        %c0_38 = arith.constant 0 : index
        %c0_39 = arith.constant 0 : index
        %71 = vector.load %arg8[%c0_37, %c0_38, %c0_39] : memref<1x12x128xf32, #tpu.memory_space<vmem>>, vector<1x12x128xf32>
        %72 = vector.shape_cast %71 : vector<1x12x128xf32> to vector<12x128xf32>
        %73 = vector.extract_strided_slice %70 {offsets = [0, 0], sizes = [12, 128], strides = [1, 1]} : vector<12x256xf32> to vector<12x128xf32>
        %74 = vector.extract_strided_slice %70 {offsets = [0, 128], sizes = [12, 128], strides = [1, 1]} : vector<12x256xf32> to vector<12x128xf32>
        %75 = arith.addf %73, %74 : vector<12x128xf32>
        %76 = arith.addf %72, %75 : vector<12x128xf32>
        %c0_40 = arith.constant 0 : index
        %c0_41 = arith.constant 0 : index
        %c0_42 = arith.constant 0 : index
        %77 = vector.load %arg8[%c0_40, %c0_41, %c0_42] : memref<1x12x128xf32, #tpu.memory_space<vmem>>, vector<1x12x128xf32>
        %78 = vector.shape_cast %77 : vector<1x12x128xf32> to vector<12x128xf32>
        %79 = vector.shape_cast %76 : vector<12x128xf32> to vector<1x12x128xf32>
        tpu.vector_store %arg8[%c0_40, %c0_41, %c0_42], %79 {strides = array<i32>} : memref<1x12x128xf32, #tpu.memory_space<vmem>>, vector<1x12x128xf32>,
      } else {
      }
    } else {
    }
    return
  }
  func.func @transform_0(%arg0: i32, %arg1: i32, %arg2: i32) -> (i32, i32) {
    %c1_i32 = arith.constant 1 : i32
    %0 = arith.muli %arg0, %c1_i32 : i32
    %1 = arith.addi %0, %arg2 : i32
    %c0_i32 = arith.constant 0 : i32
    %2 = arith.minsi %1, %c0_i32 : i32
    %c0_i32_0 = arith.constant 0 : i32
    return %arg1, %2 : i32, i32
  }
  func.func @transform_1(%arg0: i32, %arg1: i32, %arg2: i32) -> (i32, i32) {
    %c1_i32 = arith.constant 1 : i32
    %0 = arith.muli %arg0, %c1_i32 : i32
    %1 = arith.addi %0, %arg2 : i32
    %c0_i32 = arith.constant 0 : i32
    %2 = arith.minsi %1, %c0_i32 : i32
    %c0_i32_0 = arith.constant 0 : i32
    return %arg1, %2 : i32, i32
  }
  func.func @transform_2(%arg0: i32, %arg1: i32, %arg2: i32) -> (i32, i32, i32) {
    %c1_i32 = arith.constant 1 : i32
    %0 = arith.muli %arg0, %c1_i32 : i32
    %1 = arith.addi %0, %arg1 : i32
    %c0_i32 = arith.constant 0 : i32
    %c0_i32_0 = arith.constant 0 : i32
    %c0_i32_1 = arith.constant 0 : i32
    return %1, %c0_i32, %c0_i32_0 : i32, i32, i32
  }
  func.func @transform_3(%arg0: i32, %arg1: i32, %arg2: i32) -> (i32, i32, i32) {
    %c1_i32 = arith.constant 1 : i32
    %0 = arith.muli %arg0, %c1_i32 : i32
    %1 = arith.addi %0, %arg1 : i32
    %c0_i32 = arith.constant 0 : i32
    %c0_i32_0 = arith.constant 0 : i32
    %c0_i32_1 = arith.constant 0 : i32
    return %1, %c0_i32, %c0_i32_0 : i32, i32, i32
  }
  func.func @transform_4(%arg0: i32, %arg1: i32, %arg2: i32) -> (i32, i32, i32) {
    %c1_i32 = arith.constant 1 : i32
    %0 = arith.muli %arg0, %c1_i32 : i32
    %1 = arith.addi %0, %arg1 : i32
    %c0_i32 = arith.constant 0 : i32
    %c0_i32_0 = arith.constant 0 : i32
    %c0_i32_1 = arith.constant 0 : i32
    return %1, %c0_i32, %c0_i32_0 : i32, i32, i32
  }
  func.func @transform_5(%arg0: i32, %arg1: i32, %arg2: i32) -> (i32, i32, i32) {
    %c1_i32 = arith.constant 1 : i32
    %0 = arith.muli %arg0, %c1_i32 : i32
    %1 = arith.addi %0, %arg1 : i32
    %c0_i32 = arith.constant 0 : i32
    %c0_i32_0 = arith.constant 0 : i32
    %c0_i32_1 = arith.constant 0 : i32
    return %1, %c0_i32, %c0_i32_0 : i32, i32, i32
  }
}

</mosaic_0001>

<bundles_post_ra>
// kernel: tpu_custom_call.1
= control target key start
LH: loop header
LB: loop body
LE: loop exit
PB: predicated region body
PF: predicated region fallthrough
CT: control target
= control target key end

     0   :  { %11 = vsyncpa [#allocation3], 0  ;;  %s625_s0 = inlined_call_operand.hbm [shape: f32[12,256], index: 0, kind: input, shape index: {}]   ;;  %s626_s1 = inlined_call_operand.hbm [shape: f32[12,256], index: 1, kind: input, shape index: {}]   ;;  %s627_s2 = inlined_call_operand.vmem [shape: f32[1,12,128], index: 2, kind: output, shape index: {0}]   ;;  %s628_s3 = inlined_call_operand.vmem [shape: f32[1,12,128], index: 3, kind: output, shape index: {1}]   ;;  %s629_s4 = inlined_call_operand.vmem [shape: f32[1,12,128], index: 4, kind: output, shape index: {2}]   ;;  %s630_s5 = inlined_call_operand.vmem [shape: f32[1,12,128], index: 5, kind: output, shape index: {3}]  }
   0x1   :  { %12 = vsyncpa [#allocation5], 0  ;;  %s512_s18 = smov [#allocation2]  }
   0x2   :  { %s24_s19 = sshll.u32 %s512_s18, 4  ;;  %s25_s19 = int_to_ptr.vmem [resolvable:$true] %s24_s19 }
   0x3   :  { %s476_s20 = scalar_lea.vmem %s25_s19, 512  ;;  %p481_p1 = scmp.lt.s32.totalorder %s25_s19, %s25_s19 }
   0x4   :  { %p477_p0 = scmp.ne.s32.totalorder %s25_s19, %s476_s20  ;;  %p482_p2 = scmp.lt.s32.totalorder %s476_s20, %s476_s20 }
   0x6   :  { %p483_p3 = por %p482_p2, %p481_p1 }
   0x8   :  { %p484_p4 = pnand %p483_p3, %p477_p0 }
   0xa   :  { %487 = shalt.err (!%p484_p4)
}
   0xb   :  { %s513_s21 = smov 256   ;;  %s514_s22 = smov 16  }
   0xc   :  { %30 = dma.hbm_to_vmem [thread:$0]  %s625_s0, 512, %s25_s19, [#allocation3], %s513_s21, %s513_s21, %s514_s22  }
   0xd   :  { %s515_s25 = smov [#allocation4]  }
   0xe   :  { %s42_s26 = sshll.u32 %s515_s25, 4  ;;  %s43_s26 = int_to_ptr.vmem [resolvable:$true] %s42_s26 }
   0xf   :  { %s496_s27 = scalar_lea.vmem %s43_s26, 512  ;;  %p501_p6 = scmp.lt.s32.totalorder %s43_s26, %s43_s26 }
  0x10   :  { %p497_p5 = scmp.ne.s32.totalorder %s43_s26, %s496_s27  ;;  %p502_p7 = scmp.lt.s32.totalorder %s496_s27, %s496_s27 }
  0x12   :  { %p503_p8 = por %p502_p7, %p501_p6 }
  0x14   :  { %p504_p9 = pnand %p503_p8, %p497_p5 }
  0x16   :  { %507 = shalt.err (!%p504_p9)
}
  0x17   :  { %48 = dma.hbm_to_vmem [thread:$0]  %s626_s1, 512, %s43_s26, [#allocation5], %s513_s21, %s513_s21, %s514_s22  }
  0x18   :  { %508 = dma.done.wait [#allocation3], 512  }
  0x19   :  { %509 = vsyncadd [#allocation3], 4294966784 }
  0x1a   :  { %510 = dma.done.wait [#allocation5], 512  }
  0x1b   :  { %511 = vsyncadd [#allocation5], 4294966784  ;;  %v516_v0 = vmov 0.0   ;;  %v134_v1 = vld [vmem:[#allocation2] sm:$0xff]  ;;  %v135_v2 = vld [vmem:[#allocation2 + $0x8] sm:$0xff] }
  0x1c   :  { %120 = vst [vmem:[%s627_s2 + $0x8] sm:$0xf] %v516_v0  ;;  %122 = vst [vmem:[%s628_s3 + $0x8] sm:$0xf] %v516_v0  ;;  %v565_v3 = vld [vmem:[#allocation4] sm:$0xff]  ;;  %v567_v4 = vld [vmem:[#allocation4 + $0x8] sm:$0xff]  ;;  %452 = vlog2.f32 %v134_v1  ;;  %v156_v13 = vadd.f32 %v135_v2, %v134_v1 }
  0x1d   :  { %124 = vst [vmem:[%s629_s4 + $0x8] sm:$0xf] %v516_v0  ;;  %126 = vst [vmem:[%s630_s5 + $0x8] sm:$0xf] %v516_v0  ;;  %v144_v5 = vmul.f32 %v565_v3, %v134_v1  ;;  %v182_v6 = vsub.f32 1.0, %v134_v1  ;;  %v183_v7 = vsub.f32 1.0, %v135_v2  ;;  %v145_v9 = vmul.f32 %v567_v4, %v135_v2 }
  0x1e   :  { %v136_v8 = vld [vmem:[#allocation2 + $0x10] sm:$0xf]  ;;  %454 = vlog2.f32 %v135_v2  ;;  %v137_v10 = vld [vmem:[#allocation2 + $0x18] sm:$0xf]  ;;  %v164_v14 = vadd.f32 %v567_v4, %v565_v3  ;;  %160 = vst [vmem:[%s628_s3] sm:$0xff] %v156_v13  ;;  %v202_v42 = vsub.f32 1.0, %v565_v3  ;;  %v203_v46 = vsub.f32 1.0, %v567_v4 }
  0x1f   :  { %v571_v11 = vld [vmem:[#allocation4 + $0x10] sm:$0xf]  ;;  %v573_v12 = vld [vmem:[#allocation4 + $0x18] sm:$0xf]  ;;  %456 = vlog2.f32 %v136_v8  ;;  %v184_v18 = vsub.f32 1.0, %v136_v8  ;;  %v148_v19 = vadd.f32 %v145_v9, %v144_v5  ;;  %v185_v20 = vsub.f32 1.0, %v137_v10 }
  0x20   :  { %v146_v16 = vmul.f32 %v571_v11, %v136_v8  ;;  %v147_v17 = vmul.f32 %v573_v12, %v137_v10  ;;  %458 = vlog2.f32 %v137_v10  ;;  %v157_v24 = vadd.f32 %v137_v10, %v136_v8  ;;  %168 = vst [vmem:[%s629_s4] sm:$0xff] %v164_v14 }
  0x21   :  { %v165_v25 = vadd.f32 %v573_v12, %v571_v11  ;;  %460 = vlog2.f32 %v182_v6  ;;  %152 = vst [vmem:[%s627_s2] sm:$0xff] %v148_v19  ;;  %v204_v52 = vsub.f32 1.0, %v571_v11  ;;  %v205_v56 = vsub.f32 1.0, %v573_v12 }
  0x22   :  { %v149_v23 = vadd.f32 %v147_v17, %v146_v16  ;;  %462 = vlog2.f32 %v183_v7 }
  0x23   :  { %v143_v15 = vld [vmem:[%s627_s2 + $0x8] sm:$0xf]  ;;  %464 = vlog2.f32 %v184_v18 }
  0x24   :  { %v155_v21 = vld [vmem:[%s628_s3 + $0x8] sm:$0xf]  ;;  %v151_v26 = vadd.f32 %v149_v23, %v143_v15  ;;  %466 = vlog2.f32 %v185_v20 }
  0x25   :  { %v163_v22 = vld [vmem:[%s629_s4 + $0x8] sm:$0xf]  ;;  %v159_v27 = vadd.f32 %v157_v24, %v155_v21 }
  0x26   :  { %v167_v28 = vadd.f32 %v165_v25, %v163_v22  ;;  %153 = vst [vmem:[%s627_s2 + $0x8] sm:$0xf] %v151_v26  ;;  %v219_v10 = vld [vmem:[%s630_s5 + $0x8] sm:$0xf] }
  0x27   :  { %161 = vst [vmem:[%s628_s3 + $0x8] sm:$0xf] %v159_v27 }
  0x28   :  { %169 = vst [vmem:[%s629_s4 + $0x8] sm:$0xf] %v167_v28 }
  0x29   :  { %v453_v29 = vpop.eup %452 }
  0x2a   :  { %v171_v31 = vmul.f32 0.6931472, %v453_v29 }
  0x2b   :  { %v455_v30 = vpop.eup %454 }
  0x2c   :  { %v457_v32 = vpop.eup %456  ;;  %v173_v33 = vmul.f32 0.6931472, %v455_v30  ;;  %v178_v36 = vmax.f32 %v171_v31, -100.0 }
  0x2d   :  { %v459_v34 = vpop.eup %458  ;;  %v175_v35 = vmul.f32 0.6931472, %v457_v32 }
  0x2e   :  { %v177_v37 = vmul.f32 0.6931472, %v459_v34  ;;  %v461_v38 = vpop.eup %460  ;;  %v179_v39 = vmax.f32 %v173_v33, -100.0  ;;  %v198_v50 = vmul.f32 %v178_v36, %v565_v3 }
  0x2f   :  { %v463_v40 = vpop.eup %462  ;;  %v187_v41 = vmul.f32 0.6931472, %v461_v38  ;;  %v180_v43 = vmax.f32 %v175_v35, -100.0 }
  0x30   :  { %v465_v44 = vpop.eup %464  ;;  %v189_v45 = vmul.f32 0.6931472, %v463_v40  ;;  %v181_v47 = vmax.f32 %v177_v37, -100.0  ;;  %v199_v54 = vmul.f32 %v179_v39, %v567_v4 }
  0x31   :  { %v467_v48 = vpop.eup %466  ;;  %v194_v49 = vmax.f32 %v187_v41, -100.0  ;;  %v191_v51 = vmul.f32 0.6931472, %v465_v44  ;;  %v200_v59 = vmul.f32 %v180_v43, %v571_v11 }
  0x32   :  { %v195_v53 = vmax.f32 %v189_v45, -100.0  ;;  %v193_v55 = vmul.f32 0.6931472, %v467_v48  ;;  %v201_v62 = vmul.f32 %v181_v47, %v573_v12 }
  0x33   :  { %v206_v57 = vmul.f32 %v202_v42, %v194_v49  ;;  %v196_v58 = vmax.f32 %v191_v51, -100.0 }
  0x34   :  { %v207_v60 = vmul.f32 %v203_v46, %v195_v53  ;;  %v197_v61 = vmax.f32 %v193_v55, -100.0 }
  0x35   :  { %v210_v63 = vadd.f32 %v206_v57, %v198_v50  ;;  %v208_v0 = vmul.f32 %v204_v52, %v196_v58 }
  0x36   :  { %v211_v1 = vadd.f32 %v207_v60, %v199_v54  ;;  %v209_v2 = vmul.f32 %v205_v56, %v197_v61 }
  0x37   :  { %v214_v3 = vsub.f32 0.0, %v210_v63  ;;  %v212_v5 = vadd.f32 %v208_v0, %v200_v59 }
  0x38   :  { %v215_v6 = vsub.f32 0.0, %v211_v1  ;;  %v213_v7 = vadd.f32 %v209_v2, %v201_v62 }
  0x39   :  { %v216_v4 = vsub.f32 0.0, %v212_v5 }
  0x3a   :  { %v220_v8 = vadd.f32 %v215_v6, %v214_v3  ;;  %v217_v9 = vsub.f32 0.0, %v213_v7 }
  0x3c   :  { %v221_v11 = vadd.f32 %v217_v9, %v216_v4  ;;  %224 = vst [vmem:[%s630_s5] sm:$0xff] %v220_v8 }
  0x3e   :  { %v223_v12 = vadd.f32 %v221_v11, %v219_v10 }
  0x40   :  { %225 = vst [vmem:[%s630_s5 + $0x8] sm:$0xf] %v223_v12 }
  0x41   :  { %409 = vsyncpa [#allocation3], 1 }
  0x42   :  { %410 = vsyncpa [#allocation5], 1 }

</bundles_post_ra>
